<compile_context>
chip_gen: v7x
topology: tpu7x:2x2x1
jax: 0.10.0
libtpu: 0.0.40
codegen_flags: <defaults>
</compile_context>

<pallas_src>
import functools
import math

import jax
import jax.numpy as jnp
from jax.experimental import pallas as pl
from jax.experimental.pallas import tpu as pltpu

_VMEM_LIMIT_BYTES = 32 * 1024 * 1024  # safe on v5e/v6e/v7x; tiles use far less


def _round_up(x, m):
    return ((x + m - 1) // m) * m


def _flatten_w(w):
    """(H, in_dim, Dw) -> (in_dim, H*Dw), head-major along the output dim."""
    h, in_dim, dw = w.shape
    return jnp.transpose(w, (1, 0, 2)).reshape(in_dim, h * dw)


# --------------------------------------------------------------------------- #
# Kernel 1: fused Q/K/V projection (one pass over h, weights VMEM-resident).  #
#   Writes head-major q (tq, H*D), k (tq, H*D), v_aug (tq, H*(D+1)) directly  #
#   in the layout the attention kernel consumes (no XLA transposes between).  #
# --------------------------------------------------------------------------- #
def _qkv_proj_kernel(h_ref, wq_ref, wk_ref, wv_ref, bq_ref, bk_ref, bv_ref,
                     q_ref, k_ref, v_ref):
    hb = h_ref[...]
    q_ref[...] = (jnp.dot(hb, wq_ref[...], preferred_element_type=jnp.float32)
                  + bq_ref[...]).astype(q_ref.dtype)
    k_ref[...] = (jnp.dot(hb, wk_ref[...], preferred_element_type=jnp.float32)
                  + bk_ref[...]).astype(k_ref.dtype)
    v_ref[...] = (jnp.dot(hb, wv_ref[...], preferred_element_type=jnp.float32)
                  + bv_ref[...]).astype(v_ref.dtype)


# --------------------------------------------------------------------------- #
# Kernel 2: tiled masked-exp attention, all heads in the body.                #
#   grid = (num_dst_tiles, num_src_tiles); src axis is the reduction.         #
#   adj tile is fetched once and reused for every head.                       #
# --------------------------------------------------------------------------- #
def _attn_kernel(flags_ref, q_ref, k_ref, v_ref, adj_ref, out_ref, acc_ref,
                 *, num_heads, head_dim, approx_recip):
    H, D = num_heads, head_dim
    Da = D + 1
    i = pl.program_id(0)
    kk = pl.program_id(1)
    nk = pl.num_programs(1)

    @pl.when(kk == 0)
    def _():
        acc_ref[...] = jnp.zeros_like(acc_ref)

    # Skip tiles whose adjacency block is entirely zero (sparse graphs).
    @pl.when(flags_ref[i * nk + kk] > 0)
    def _():
        adj_mask = adj_ref[...] != 0          # (tq, tk) bool, from int8 mask
        qb = q_ref[...]                       # (tq, H*D), 1/sqrt(D) folded in
        kb = k_ref[...]                       # (tk, H*D)
        vb = v_ref[...]                       # (tk, H*(D+1)), ones column per head
        for hh in range(H):                   # static unroll; adj reused per head
            q_h = qb[:, hh * D:(hh + 1) * D]
            k_h = kb[:, hh * D:(hh + 1) * D]
            v_h = vb[:, hh * Da:(hh + 1) * Da]
            # score[dst, src] = q[dst] . k[src]   (MXU, f32 accumulation)
            scores = jax.lax.dot_general(
                q_h, k_h, (((1,), (1,)), ((), ())),
                preferred_element_type=jnp.float32)
            s = jnp.where(adj_mask, jnp.exp(jnp.clip(scores, -5.0, 5.0)), 0.0)
            # [wV | z] in one MXU matmul: v_h's last column is all-ones.
            acc_ref[hh] = acc_ref[hh] + jnp.dot(
                s.astype(v_h.dtype), v_h, preferred_element_type=jnp.float32)

    @pl.when(kk == nk - 1)
    def _():
        for hh in range(H):
            acc_h = acc_ref[hh]               # (tq, D+1) f32
            wv = acc_h[:, :D]
            z = acc_h[:, D:Da]
            denom = z + 1e-6
            if approx_recip:
                res = wv * pl.reciprocal(denom, approx=True)
            else:
                res = wv / denom
            out_ref[:, hh * D:(hh + 1) * D] = res.astype(out_ref.dtype)


# --------------------------------------------------------------------------- #
# Wrapper                                                                     #
# --------------------------------------------------------------------------- #
def multi_head_attention_forward(h, adj, Wq, Wk, Wv, bq, bk, bv, *,
                                 num_heads, out_dim,
                                 compute_dtype=jnp.bfloat16,
                                 tile_q=512, tile_k=1024):
    """h: (N, in_dim) f32, adj: (N, N) mask with adj[dst, src]=1 iff edge src->dst.
    Returns head_out: (N, num_heads, out_dim) f32."""
    N, in_dim = h.shape
    H, D = num_heads, out_dim
    Da = D + 1
    scale = float(math.sqrt(out_dim))

    # ---- tile sizes / padding (block last dims must be aligned or full) ------
    if N <= max(tile_q, tile_k):
        tq = tk = N
        n_pad = N
    else:
        tq, tk = tile_q, tile_k                     # 512, 1024 -> 128-aligned
        n_pad = _round_up(N, tq * tk // math.gcd(tq, tk))
    nq, nk = n_pad // tq, n_pad // tk

    pad = n_pad - N
    h_pad = jnp.pad(h, ((0, pad), (0, 0))) if pad else h
    adj_pad = jnp.pad(adj, ((0, pad), (0, pad))) if pad else adj

    # ---- weights: fold 1/sqrt(D) into Q; append a "ones" column per head to V
    #      (weight 0, bias 1) so z rides the s @ V_aug matmul (no XLU row-sum).
    Wq_f = (_flatten_w(Wq) / scale).astype(compute_dtype)          # (in_dim, H*D)
    Wk_f = _flatten_w(Wk).astype(compute_dtype)                    # (in_dim, H*D)
    Wv_aug = jnp.concatenate([Wv, jnp.zeros((H, in_dim, 1), Wv.dtype)], axis=-1)
    Wv_f = _flatten_w(Wv_aug).astype(compute_dtype)                # (in_dim, H*(D+1))
    bq_f = (bq / scale).reshape(1, H * D).astype(jnp.float32)
    bk_f = bk.reshape(1, H * D).astype(jnp.float32)
    bv_aug = jnp.concatenate([bv, jnp.ones((H, 1, 1), bv.dtype)], axis=-1)
    bv_f = bv_aug.reshape(1, H * Da).astype(jnp.float32)

    # ---- fused projection kernel (row-tiled, weights VMEM-resident) ----------
    q, k, v = pl.pallas_call(
        _qkv_proj_kernel,
        out_shape=(
            jax.ShapeDtypeStruct((n_pad, H * D), compute_dtype),
            jax.ShapeDtypeStruct((n_pad, H * D), compute_dtype),
            jax.ShapeDtypeStruct((n_pad, H * Da), compute_dtype),
        ),
        grid_spec=pltpu.PrefetchScalarGridSpec(
            num_scalar_prefetch=0,
            grid=(nq,),
            in_specs=[
                pl.BlockSpec((tq, in_dim), lambda i: (i, 0)),
                pl.BlockSpec((in_dim, H * D), lambda i: (0, 0)),
                pl.BlockSpec((in_dim, H * D), lambda i: (0, 0)),
                pl.BlockSpec((in_dim, H * Da), lambda i: (0, 0)),
                pl.BlockSpec((1, H * D), lambda i: (0, 0)),
                pl.BlockSpec((1, H * D), lambda i: (0, 0)),
                pl.BlockSpec((1, H * Da), lambda i: (0, 0)),
            ],
            out_specs=(
                pl.BlockSpec((tq, H * D), lambda i: (i, 0)),
                pl.BlockSpec((tq, H * D), lambda i: (i, 0)),
                pl.BlockSpec((tq, H * Da), lambda i: (i, 0)),
            ),
        ),
        compiler_params=pltpu.CompilerParams(
            dimension_semantics=("parallel",),
            vmem_limit_bytes=_VMEM_LIMIT_BYTES),
    )(h_pad.astype(compute_dtype), Wq_f, Wk_f, Wv_f, bq_f, bk_f, bv_f)

    # ---- adjacency as int8 mask; flat 1-D per-tile nonzero flags (SMEM) ------
    adj_i8 = (adj_pad != 0).astype(jnp.int8)
    flags = (adj_pad.reshape(nq, tq, nk, tk) != 0).any(axis=(1, 3))
    flags = flags.reshape(-1).astype(jnp.int32)                    # (nq*nk,)

    kernel = functools.partial(
        _attn_kernel, num_heads=H, head_dim=D,
        approx_recip=(compute_dtype != jnp.float32))

    # ---- tiled attention kernel (heads folded into the body) -----------------
    out_flat = pl.pallas_call(
        kernel,
        out_shape=jax.ShapeDtypeStruct((n_pad, H * D), jnp.float32),
        grid_spec=pltpu.PrefetchScalarGridSpec(
            num_scalar_prefetch=1,
            grid=(nq, nk),
            in_specs=[
                pl.BlockSpec((tq, H * D), lambda i, kk, fl: (i, 0)),    # q
                pl.BlockSpec((tk, H * D), lambda i, kk, fl: (kk, 0)),   # k
                pl.BlockSpec((tk, H * Da), lambda i, kk, fl: (kk, 0)),  # v_aug
                pl.BlockSpec((tq, tk), lambda i, kk, fl: (i, kk)),      # adj int8
            ],
            out_specs=pl.BlockSpec((tq, H * D), lambda i, kk, fl: (i, 0)),
            scratch_shapes=[
                pltpu.VMEM((H, tq, Da), jnp.float32),   # [wV | z] accumulator
            ],
        ),
        compiler_params=pltpu.CompilerParams(
            dimension_semantics=("parallel", "arbitrary"),
            vmem_limit_bytes=_VMEM_LIMIT_BYTES),
    )(flags, q, k, v, adj_i8)

    # head-major columns -> (N, H, D) is a free contiguous reshape (no transpose)
    return out_flat[:N].reshape(N, H, D)


# --------------------------------------------------------------------------- #
# Pure-JAX reference (identical semantics) for verification                   #
# --------------------------------------------------------------------------- #
def _reference_forward(h, adj, Wq, Wk, Wv, bq, bk, bv, out_dim):
    scale = math.sqrt(out_dim)
    q = jnp.einsum('ni,hid->nhd', h, Wq) + bq.reshape(1, bq.shape[0], out_dim)
    k = jnp.einsum('ni,hid->nhd', h, Wk) + bk.reshape(1, bk.shape[0], out_dim)
    v = jnp.einsum('ni,hid->nhd', h, Wv) + bv.reshape(1, bv.shape[0], out_dim)
    scores = jnp.einsum('vhd,uhd->vuh', q, k) / scale
    s = jnp.exp(jnp.clip(scores, -5.0, 5.0)) * adj[:, :, None]
    wV = jnp.einsum('vuh,uhd->vhd', s, v)
    z = jnp.sum(s, axis=1)                       # (N, H)
    return wV / (z[..., None] + 1e-6)


if __name__ == "__main__":
    # Module hyperparameters (small, consistent with the forward pass).
    N = 8          # number of graph nodes
    in_dim = 32
    out_dim = 16
    num_heads = 2
    use_bias = True

    key = jax.random.PRNGKey(0)
    kh, kq, kk, kv, kbq, kbk, kbv = jax.random.split(key, 7)

    w_scale = 1.0 / math.sqrt(in_dim)
    Wq = jax.random.uniform(kq, (num_heads, in_dim, out_dim), jnp.float32,
                            -w_scale, w_scale)
    Wk = jax.random.uniform(kk, (num_heads, in_dim, out_dim), jnp.float32,
                            -w_scale, w_scale)
    Wv = jax.random.uniform(kv, (num_heads, in_dim, out_dim), jnp.float32,
                            -w_scale, w_scale)
    if use_bias:
        bq = jax.random.uniform(kbq, (num_heads, 1, out_dim), jnp.float32,
                                -w_scale, w_scale)
        bk = jax.random.uniform(kbk, (num_heads, 1, out_dim), jnp.float32,
                                -w_scale, w_scale)
        bv = jax.random.uniform(kbv, (num_heads, 1, out_dim), jnp.float32,
                                -w_scale, w_scale)
    else:
        bq = jnp.zeros((num_heads, 1, out_dim), jnp.float32)
        bk = jnp.zeros((num_heads, 1, out_dim), jnp.float32)
        bv = jnp.zeros((num_heads, 1, out_dim), jnp.float32)

    h = jax.random.normal(kh, (N, in_dim), jnp.float32)

    # Deterministic graph: directed ring (u -> u+1 mod N) plus self-loops,
    # encoded as dense adjacency mask adj[dst, src].
    src = jnp.arange(N)
    adj = jnp.zeros((N, N), jnp.float32)
    adj = adj.at[src, src].set(1.0)                    # self-loops
    adj = adj.at[(src + 1) % N, src].set(1.0)          # ring edges u -> u+1

    ref = _reference_forward(h, adj, Wq, Wk, Wv, bq, bk, bv, out_dim)

    # Fast path: bf16 MXU operands, f32 accumulation.
    out_bf16 = multi_head_attention_forward(
        h, adj, Wq, Wk, Wv, bq, bk, bv, num_heads=num_heads, out_dim=out_dim,
        compute_dtype=jnp.bfloat16)
    out_bf16 = jax.block_until_ready(out_bf16)
    assert out_bf16.shape == (N, num_heads, out_dim)
    assert jnp.allclose(out_bf16, ref, rtol=3e-2, atol=3e-2)

    # Strict path: full f32 (exact division), tight tolerance vs. reference.
    out_f32 = multi_head_attention_forward(
        h, adj, Wq, Wk, Wv, bq, bk, bv, num_heads=num_heads, out_dim=out_dim,
        compute_dtype=jnp.float32)
    out_f32 = jax.block_until_ready(out_f32)
    assert jnp.allclose(out_f32, ref, rtol=1e-4, atol=1e-5)

    print("KERNEL_OK")
</pallas_src>

<mosaic_0001>
module attributes {stable_mosaic.version = 11 : i64} {
  func.func @_qkv_proj_kernel(%arg0: i32, %arg1: memref<8x32xbf16, #tpu.memory_space<vmem>>, %arg2: memref<32x32xbf16, #tpu.memory_space<vmem>>, %arg3: memref<32x32xbf16, #tpu.memory_space<vmem>>, %arg4: memref<32x34xbf16, #tpu.memory_space<vmem>>, %arg5: memref<1x32xf32, #tpu.memory_space<vmem>>, %arg6: memref<1x32xf32, #tpu.memory_space<vmem>>, %arg7: memref<1x34xf32, #tpu.memory_space<vmem>>, %arg8: memref<8x32xbf16, #tpu.memory_space<vmem>>, %arg9: memref<8x32xbf16, #tpu.memory_space<vmem>>, %arg10: memref<8x34xbf16, #tpu.memory_space<vmem>>) attributes {dimension_semantics = [#tpu.dimension_semantics<parallel>], iteration_bounds = array<i64: 1>, scalar_prefetch = 0 : i64, scratch_operands = 0 : i64, tpu.core_type = #tpu.core_type<tc>, window_params = [{transform_indices = @transform_0, window_bounds = array<i64: 8, 32>}, {pipeline_mode = #tpu.pipeline_mode<synchronous>, transform_indices = @transform_1, window_bounds = array<i64: 32, 32>}, {pipeline_mode = #tpu.pipeline_mode<synchronous>, transform_indices = @transform_2, window_bounds = array<i64: 32, 32>}, {pipeline_mode = #tpu.pipeline_mode<synchronous>, transform_indices = @transform_3, window_bounds = array<i64: 32, 34>}, {pipeline_mode = #tpu.pipeline_mode<synchronous>, transform_indices = @transform_4, window_bounds = array<i64: 1, 32>}, {pipeline_mode = #tpu.pipeline_mode<synchronous>, transform_indices = @transform_5, window_bounds = array<i64: 1, 32>}, {pipeline_mode = #tpu.pipeline_mode<synchronous>, transform_indices = @transform_6, window_bounds = array<i64: 1, 34>}, {transform_indices = @transform_7, window_bounds = array<i64: 8, 32>}, {transform_indices = @transform_8, window_bounds = array<i64: 8, 32>}, {transform_indices = @transform_9, window_bounds = array<i64: 8, 34>}]} {
    %c0 = arith.constant 0 : index
    %c0_0 = arith.constant 0 : index
    %0 = vector.load %arg1[%c0, %c0_0] : memref<8x32xbf16, #tpu.memory_space<vmem>>, vector<8x32xbf16>
    %c0_1 = arith.constant 0 : index
    %c0_2 = arith.constant 0 : index
    %1 = vector.load %arg2[%c0_1, %c0_2] : memref<32x32xbf16, #tpu.memory_space<vmem>>, vector<32x32xbf16>
    %cst = arith.constant dense<0.000000e+00> : vector<8x32xf32>
    %2 = tpu.matmul %0, %1, %cst {dimension_numbers = #tpu.dot_dimension_numbers<[1], [0], [0], [1], [0, 0, 1, 1], [], []>} : vector<8x32xbf16>, vector<32x32xbf16>, vector<8x32xf32> -> vector<8x32xf32>
    %c0_3 = arith.constant 0 : index
    %c0_4 = arith.constant 0 : index
    %3 = vector.load %arg5[%c0_3, %c0_4] : memref<1x32xf32, #tpu.memory_space<vmem>>, vector<1x32xf32>
    %4 = vector.broadcast %3 : vector<1x32xf32> to vector<8x32xf32>
    %5 = arith.addf %2, %4 : vector<8x32xf32>
    %6 = arith.truncf %5 : vector<8x32xf32> to vector<8x32xbf16>
    %c0_5 = arith.constant 0 : index
    %c0_6 = arith.constant 0 : index
    %7 = vector.load %arg8[%c0_5, %c0_6] : memref<8x32xbf16, #tpu.memory_space<vmem>>, vector<8x32xbf16>
    tpu.vector_store %arg8[%c0_5, %c0_6], %6 {strides = array<i32>} : memref<8x32xbf16, #tpu.memory_space<vmem>>, vector<8x32xbf16>,
    %c0_7 = arith.constant 0 : index
    %c0_8 = arith.constant 0 : index
    %8 = vector.load %arg3[%c0_7, %c0_8] : memref<32x32xbf16, #tpu.memory_space<vmem>>, vector<32x32xbf16>
    %cst_9 = arith.constant dense<0.000000e+00> : vector<8x32xf32>
    %9 = tpu.matmul %0, %8, %cst_9 {dimension_numbers = #tpu.dot_dimension_numbers<[1], [0], [0], [1], [0, 0, 1, 1], [], []>} : vector<8x32xbf16>, vector<32x32xbf16>, vector<8x32xf32> -> vector<8x32xf32>
    %c0_10 = arith.constant 0 : index
    %c0_11 = arith.constant 0 : index
    %10 = vector.load %arg6[%c0_10, %c0_11] : memref<1x32xf32, #tpu.memory_space<vmem>>, vector<1x32xf32>
    %11 = vector.broadcast %10 : vector<1x32xf32> to vector<8x32xf32>
    %12 = arith.addf %9, %11 : vector<8x32xf32>
    %13 = arith.truncf %12 : vector<8x32xf32> to vector<8x32xbf16>
    %c0_12 = arith.constant 0 : index
    %c0_13 = arith.constant 0 : index
    %14 = vector.load %arg9[%c0_12, %c0_13] : memref<8x32xbf16, #tpu.memory_space<vmem>>, vector<8x32xbf16>
    tpu.vector_store %arg9[%c0_12, %c0_13], %13 {strides = array<i32>} : memref<8x32xbf16, #tpu.memory_space<vmem>>, vector<8x32xbf16>,
    %c0_14 = arith.constant 0 : index
    %c0_15 = arith.constant 0 : index
    %15 = vector.load %arg4[%c0_14, %c0_15] : memref<32x34xbf16, #tpu.memory_space<vmem>>, vector<32x34xbf16>
    %cst_16 = arith.constant dense<0.000000e+00> : vector<8x34xf32>
    %16 = tpu.matmul %0, %15, %cst_16 {dimension_numbers = #tpu.dot_dimension_numbers<[1], [0], [0], [1], [0, 0, 1, 1], [], []>} : vector<8x32xbf16>, vector<32x34xbf16>, vector<8x34xf32> -> vector<8x34xf32>
    %c0_17 = arith.constant 0 : index
    %c0_18 = arith.constant 0 : index
    %17 = vector.load %arg7[%c0_17, %c0_18] : memref<1x34xf32, #tpu.memory_space<vmem>>, vector<1x34xf32>
    %18 = vector.broadcast %17 : vector<1x34xf32> to vector<8x34xf32>
    %19 = arith.addf %16, %18 : vector<8x34xf32>
    %20 = arith.truncf %19 : vector<8x34xf32> to vector<8x34xbf16>
    %c0_19 = arith.constant 0 : index
    %c0_20 = arith.constant 0 : index
    %21 = vector.load %arg10[%c0_19, %c0_20] : memref<8x34xbf16, #tpu.memory_space<vmem>>, vector<8x34xbf16>
    tpu.vector_store %arg10[%c0_19, %c0_20], %20 {strides = array<i32>} : memref<8x34xbf16, #tpu.memory_space<vmem>>, vector<8x34xbf16>,
    return
  }
  func.func @transform_0(%arg0: i32) -> (i32, i32) {
    %c0_i32 = arith.constant 0 : i32
    %c0_i32_0 = arith.constant 0 : i32
    return %arg0, %c0_i32 : i32, i32
  }
  func.func @transform_1(%arg0: i32) -> (i32, i32) {
    %c0_i32 = arith.constant 0 : i32
    %c0_i32_0 = arith.constant 0 : i32
    %c0_i32_1 = arith.constant 0 : i32
    return %c0_i32, %c0_i32_0 : i32, i32
  }
  func.func @transform_2(%arg0: i32) -> (i32, i32) {
    %c0_i32 = arith.constant 0 : i32
    %c0_i32_0 = arith.constant 0 : i32
    %c0_i32_1 = arith.constant 0 : i32
    return %c0_i32, %c0_i32_0 : i32, i32
  }
  func.func @transform_3(%arg0: i32) -> (i32, i32) {
    %c0_i32 = arith.constant 0 : i32
    %c0_i32_0 = arith.constant 0 : i32
    %c0_i32_1 = arith.constant 0 : i32
    return %c0_i32, %c0_i32_0 : i32, i32
  }
  func.func @transform_4(%arg0: i32) -> (i32, i32) {
    %c0_i32 = arith.constant 0 : i32
    %c0_i32_0 = arith.constant 0 : i32
    %c0_i32_1 = arith.constant 0 : i32
    return %c0_i32, %c0_i32_0 : i32, i32
  }
  func.func @transform_5(%arg0: i32) -> (i32, i32) {
    %c0_i32 = arith.constant 0 : i32
    %c0_i32_0 = arith.constant 0 : i32
    %c0_i32_1 = arith.constant 0 : i32
    return %c0_i32, %c0_i32_0 : i32, i32
  }
  func.func @transform_6(%arg0: i32) -> (i32, i32) {
    %c0_i32 = arith.constant 0 : i32
    %c0_i32_0 = arith.constant 0 : i32
    %c0_i32_1 = arith.constant 0 : i32
    return %c0_i32, %c0_i32_0 : i32, i32
  }
  func.func @transform_7(%arg0: i32) -> (i32, i32) {
    %c0_i32 = arith.constant 0 : i32
    %c0_i32_0 = arith.constant 0 : i32
    return %arg0, %c0_i32 : i32, i32
  }
  func.func @transform_8(%arg0: i32) -> (i32, i32) {
    %c0_i32 = arith.constant 0 : i32
    %c0_i32_0 = arith.constant 0 : i32
    return %arg0, %c0_i32 : i32, i32
  }
  func.func @transform_9(%arg0: i32) -> (i32, i32) {
    %c0_i32 = arith.constant 0 : i32
    %c0_i32_0 = arith.constant 0 : i32
    return %arg0, %c0_i32 : i32, i32
  }
}

</mosaic_0001>

<bundles_post_ra>
// kernel: tpu_custom_call.1
= control target key start
LH: loop header
LB: loop body
LE: loop exit
PB: predicated region body
PF: predicated region fallthrough
CT: control target
= control target key end

     0   :  { %15 = vsyncpa [#allocation3], 0  ;;  %s732_s0 = inlined_call_operand.hbm [shape: bf16[8,32], index: 0, kind: input, shape index: {}]   ;;  %s733_s1 = inlined_call_operand.hbm [shape: bf16[32,32], index: 1, kind: input, shape index: {}]   ;;  %s734_s2 = inlined_call_operand.hbm [shape: bf16[32,32], index: 2, kind: input, shape index: {}]   ;;  %s735_s3 = inlined_call_operand.hbm [shape: bf16[32,34], index: 3, kind: input, shape index: {}]   ;;  %s736_s4 = inlined_call_operand.vmem [shape: f32[1,32], index: 4, kind: input, shape index: {}]   ;;  %s737_s5 = inlined_call_operand.vmem [shape: f32[1,32], index: 5, kind: input, shape index: {}]   ;;  %s738_s6 = inlined_call_operand.vmem [shape: f32[1,34], index: 6, kind: input, shape index: {}]   ;;  %s739_s7 = inlined_call_operand.hbm [shape: bf16[8,32], index: 7, kind: output, shape index: {0}]   ;;  %s740_s8 = inlined_call_operand.hbm [shape: bf16[8,32], index: 8, kind: output, shape index: {1}]   ;;  %s741_s9 = inlined_call_operand.hbm [shape: bf16[8,34], index: 9, kind: output, shape index: {2}]  }
   0x1   :  { %16 = vsyncpa [#allocation6], 0 }
   0x2   :  { %17 = vsyncpa [#allocation9], 0 }
   0x3   :  { %18 = vsyncpa [#allocation4], 0 }
   0x4   :  { %19 = vsyncpa [#allocation12], 0  ;;  %s557_s30 = smov [#allocation5]   ;;  %s393_s13 = scalar_lea.hbm %s733_s1, 256 }
   0x5   :  { %s35_s10 = sshll.u32 %s557_s30, 4  ;;  %p394_p0 = scmp.ne.s32.totalorder %s733_s1, %s393_s13  ;;  %s36_s10 = int_to_ptr.vmem [resolvable:$true] %s35_s10 }
   0x6   :  { %p397_p1 = scmp.lt.u32.totalorder %s393_s13, %s733_s1 }
   0x8   :  { %p399_p2 = pnand %p397_p1, %p394_p0 }
   0xa   :  { %402 = shalt.err (!%p399_p2)
}
   0xb   :  { %s403_s18 = scalar_lea.vmem %s36_s10, 256  ;;  %p408_p4 = scmp.lt.s32.totalorder %s36_s10, %s36_s10 }
   0xc   :  { %p404_p3 = scmp.ne.s32.totalorder %s36_s10, %s403_s18  ;;  %p409_p5 = scmp.lt.s32.totalorder %s403_s18, %s403_s18 }
   0xe   :  { %p410_p6 = por %p409_p5, %p408_p4 }
  0x10   :  { %p411_p7 = pnand %p410_p6, %p404_p3 }
  0x12   :  { %414 = shalt.err (!%p411_p7)
}
  0x13   :  { %s558_s19 = smov 64   ;;  %s559_s20 = smov 4  }
  0x14   :  { %41 = dma.hbm_to_vmem [thread:$0]  %s733_s1, 256, %s36_s10, [#allocation6], %s558_s19, %s558_s19, %s559_s20  }
  0x15   :  { %s560_s23 = smov [#allocation2]   ;;  %s561_s25 = smov [#allocation7]  }
  0x16   :  { %s26_s24 = sshll.u32 %s560_s23, 4  ;;  %s47_s26 = sshll.u32 %s561_s25, 4  ;;  %s27_s24 = int_to_ptr.vmem [resolvable:$true] %s26_s24  ;;  %s48_s26 = int_to_ptr.vmem [resolvable:$true] %s47_s26 }
  0x17   :  { %s415_s29 = scalar_lea.hbm %s732_s0, 64 }
  0x18   :  { %p416_p8 = scmp.ne.s32.totalorder %s732_s0, %s415_s29  ;;  %p419_p9 = scmp.lt.u32.totalorder %s415_s29, %s732_s0 }
  0x1a   :  { %p421_p10 = pnand %p419_p9, %p416_p8 }
  0x1c   :  { %424 = shalt.err (!%p421_p10)
}
  0x1d   :  { %s425_s1 = scalar_lea.vmem %s27_s24, 64  ;;  %p430_p12 = scmp.lt.s32.totalorder %s27_s24, %s27_s24 }
  0x1e   :  { %p426_p11 = scmp.ne.s32.totalorder %s27_s24, %s425_s1  ;;  %p431_p13 = scmp.lt.s32.totalorder %s425_s1, %s425_s1 }
  0x20   :  { %p432_p0 = por %p431_p13, %p430_p12 }
  0x22   :  { %p433_p1 = pnand %p432_p0, %p426_p11 }
  0x24   :  { %436 = shalt.err (!%p433_p1)
}
  0x25   :  { %29 = dma.hbm_to_vmem [thread:$0]  %s732_s0, 64, %s27_s24, [#allocation3]  }
  0x26   :  { %s437_s17 = scalar_lea.hbm %s734_s2, 256 }
  0x27   :  { %p438_p2 = scmp.ne.s32.totalorder %s734_s2, %s437_s17  ;;  %p441_p3 = scmp.lt.u32.totalorder %s437_s17, %s734_s2 }
  0x29   :  { %p443_p4 = pnand %p441_p3, %p438_p2 }
  0x2b   :  { %446 = shalt.err (!%p443_p4)
}
  0x2c   :  { %s447_s25 = scalar_lea.vmem %s48_s26, 256  ;;  %p452_p6 = scmp.lt.s32.totalorder %s48_s26, %s48_s26 }
  0x2d   :  { %p448_p5 = scmp.ne.s32.totalorder %s48_s26, %s447_s25  ;;  %p453_p7 = scmp.lt.s32.totalorder %s447_s25, %s447_s25 }
  0x2f   :  { %p454_p8 = por %p453_p7, %p452_p6 }
  0x31   :  { %p455_p9 = pnand %p454_p8, %p448_p5 }
  0x33   :  { %458 = shalt.err (!%p455_p9)
}
  0x34   :  { %53 = dma.hbm_to_vmem [thread:$0]  %s734_s2, 256, %s48_s26, [#allocation6], %s558_s19, %s558_s19, %s559_s20  }
  0x35   :  { %s562_s27 = smov [#allocation8]   ;;  %s459_s11 = scalar_lea.hbm %s735_s3, 256 }
  0x36   :  { %s59_s28 = sshll.u32 %s562_s27, 4  ;;  %p460_p10 = scmp.ne.s32.totalorder %s735_s3, %s459_s11  ;;  %s60_s28 = int_to_ptr.vmem [resolvable:$true] %s59_s28 }
  0x37   :  { %p463_p11 = scmp.lt.u32.totalorder %s459_s11, %s735_s3 }
  0x39   :  { %p465_p12 = pnand %p463_p11, %p460_p10 }
  0x3b   :  { %468 = shalt.err (!%p465_p12)
}
  0x3c   :  { %s469_s14 = scalar_lea.vmem %s60_s28, 256  ;;  %p474_p0 = scmp.lt.s32.totalorder %s60_s28, %s60_s28 }
  0x3d   :  { %p470_p13 = scmp.ne.s32.totalorder %s60_s28, %s469_s14  ;;  %p475_p1 = scmp.lt.s32.totalorder %s469_s14, %s469_s14 }
  0x3f   :  { %p476_p2 = por %p475_p1, %p474_p0 }
  0x41   :  { %p477_p3 = pnand %p476_p2, %p470_p13 }
  0x43   :  { %480 = shalt.err (!%p477_p3)
}
  0x44   :  { %65 = dma.hbm_to_vmem [thread:$0]  %s735_s3, 256, %s60_s28, [#allocation9], %s558_s19, %s558_s19, %s559_s20  }
  0x45   :  { %547 = dma.done.wait [#allocation3], 64  }
  0x46   :  { %548 = vsyncadd [#allocation3], 4294967232 }
  0x47   :  { %549 = dma.done.wait [#allocation6], 512  }
  0x48   :  { %550 = vsyncadd [#allocation6], 4294966784 }
  0x49   :  { %551 = dma.done.wait [#allocation9], 256  }
  0x4a   :  { %552 = vsyncadd [#allocation9], 4294967040  ;;  %v563_v0 = vmov 0.0   ;;  %vm564_vm0 = vmmov 0   ;;  %v387_v1 = vld [vmem:[#allocation5] sm:$0xff]   ;;  %v388_v2 = vld [vmem:[#allocation5 + $0x8] sm:$0xff]  }
  0x4b   :  { %352 = vmatprep.subr.bf16.mxu0 %v563_v0  ;;  %360 = vmatprep.subr.bf16.mxu1 %v563_v0  ;;  %v389_v3 = vld [vmem:[#allocation7] sm:$0xff]   ;;  %v391_v4 = vld [vmem:[#allocation7 + $0x8] sm:$0xff]   ;;  %vm109_vm1 = vcmask 261120   ;;  %v390_v6 = vld [vmem:[#allocation8] sm:$0xff]   ;;  %s565_s16 = smov [#allocation10]   ;;  %vm154_vm2 = vcmask 257024  }
  0x4c   :  { %356 = vmatprep.mubr.msk.bf16.mxu0 %vm564_vm0, %v563_v0  ;;  %364 = vmatprep.mubr.msk.bf16.mxu1 %vm564_vm0, %v563_v0  ;;  %v85_v5 = vld [vmem:[#allocation2] sm:$0xf]  ;;  %v392_v7 = vld [vmem:[#allocation8 + $0x8] sm:$0xff]   ;;  %s293_s17 = sshll.u32 %s565_s16, 4  ;;  %s566_s18 = smov [#allocation11]   ;;  %s294_s17 = int_to_ptr.vmem [resolvable:$true] %s293_s17 }
  0x4d   :  { %353 = vmatpush3.bf16.msra.mxu0 %v387_v1  ;;  %361 = vmatpush3.bf16.msra.mxu1 %v389_v3  ;;  %v331_v8 = vld [vmem:[%s736_s4] ss:$0 sm:$0xff]  ;;  %s303_s21 = sshll.u32 %s566_s18, 4  ;;  %s481_s22 = scalar_lea.vmem %s294_s17, 64  ;;  %s684_s21 = int_to_ptr.vmem [resolvable:$true] %s303_s21 }
  0x4e   :  { %354 = vmatprep.subr.bf16.mxu0 %v563_v0  ;;  %362 = vmatprep.subr.bf16.mxu1 %v563_v0  ;;  %v335_v10 = vld [vmem:[%s737_s5] ss:$0 sm:$0xff]  ;;  %p482_p4 = scmp.ne.s32.totalorder %s294_s17, %s481_s22  ;;  %p486_p5 = scmp.lt.s32.totalorder %s294_s17, %s294_s17 }
  0x4f   :  { %v339_v22 = vld [vmem:[%s738_s6] ss:$0 sm:$0xff]  ;;  %p487_p6 = scmp.lt.s32.totalorder %s481_s22, %s481_s22 }
  0x51   :  { %355 = vmatpush3.bf16.msra.mxu0 %v388_v2  ;;  %363 = vmatpush3.bf16.msra.mxu1 %v391_v4  ;;  %p488_p7 = por %p487_p6, %p486_p5 }
  0x52   :  { %368 = vmatprep.subr.bf16.mxu0 %v563_v0 }
  0x53   :  { %p489_p8 = pnand %p488_p7, %p482_p4 }
  0x54   :  { %357 = vmatmul.mubr.msk.bf16.vlgmr.msra.gmra.mrb[0].mxu0 %vm109_vm1, %v85_v5  ;;  %365 = vmatmul.mubr.msk.bf16.vlgmr.msra.gmra.mrb[0].mxu1 %vm109_vm1, %v85_v5 }
  0x55   :  { %369 = vmatpush3.bf16.msra.mxu0 %v390_v6  ;;  %372 = vmatprep.mubr.msk.bf16.mxu0 %vm564_vm0, %v563_v0 }
  0x56   :  { %370 = vmatprep.subr.bf16.mxu0 %v563_v0 }
  0x59   :  { %371 = vmatpush3.bf16.msra.mxu0 %v392_v7 }
  0x5c   :  { %373 = vmatmul.mubr.msk.bf16.vlgmr.msra.gmra.mrb[4].mxu0 %vm109_vm1, %v85_v5 }
 0x127   :  { %v147_v9 = vpop.f32.mrb[0].mxu0  ;;  %v213_v14 = vpop.f32.mrb[0].mxu1 }
 0x128   :  { %v148_v11 = vadd.f32 %v331_v8, %v147_v9  ;;  %v358_v12 = vpop.f32.mrb[1].mxu0  ;;  %v214_v17 = vadd.f32 %v335_v10, %v213_v14  ;;  %v366_v18 = vpop.f32.mrb[1].mxu1 }
 0x129   :  { %v150_v13 = vpop.f32.mrb[2].mxu0  ;;  %v216_v19 = vpop.f32.mrb[2].mxu1 }
 0x12a   :  { %v153_v15 = vpack.c.bf16 %v148_v11, %v148_v11  ;;  %v359_v16 = vpop.f32.mrb[3].mxu0  ;;  %v219_v20 = vpack.c.bf16 %v214_v17, %v214_v17  ;;  %v367_v21 = vpop.f32.mrb[3].mxu1 }
 0x12c   :  { %155 = vst.msk [vmem:[#allocation10] sm:$0xf] %vm154_vm2, %v153_v15 }
 0x12d   :  { %492 = shalt.err (!%p489_p8)
}
 0x12e   :  { %s493_s0 = scalar_lea.hbm %s739_s7, 64 }
 0x12f   :  { %p494_p9 = scmp.ne.s32.totalorder %s739_s7, %s493_s0  ;;  %p497_p10 = scmp.lt.u32.totalorder %s493_s0, %s739_s7 }
 0x131   :  { %p499_p11 = pnand %p497_p10, %p494_p9 }
 0x133   :  { %502 = shalt.err (!%p499_p11)
}
 0x134   :  { %296 = dma.vmem_to_hbm [thread:$0]  %s294_s17, 64, %s739_s7, [#allocation4]   ;;  %220 = vst.msk [vmem:[#allocation11] sm:$0xf] %vm154_vm2, %v219_v20  ;;  %v278_v23 = vpop.f32.mrb[4].mxu0 }
 0x135   :  { %s567_s11 = smov [#allocation13]   ;;  %s503_s13 = scalar_lea.vmem %s684_s21, 64 }
 0x136   :  { %s313_s12 = sshll.u32 %s567_s11, 4  ;;  %p504_p12 = scmp.ne.s32.totalorder %s684_s21, %s503_s13  ;;  %s314_s12 = int_to_ptr.vmem [resolvable:$true] %s313_s12 }
 0x137   :  { %p508_p13 = scmp.lt.s32.totalorder %s684_s21, %s684_s21  ;;  %p509_p0 = scmp.lt.s32.totalorder %s503_s13, %s503_s13 }
 0x139   :  { %p510_p1 = por %p509_p0, %p508_p13 }
 0x13b   :  { %p511_p2 = pnand %p510_p1, %p504_p12 }
 0x13d   :  { %514 = shalt.err (!%p511_p2)
}
 0x13e   :  { %s515_s14 = scalar_lea.hbm %s740_s8, 64 }
 0x13f   :  { %p516_p3 = scmp.ne.s32.totalorder %s740_s8, %s515_s14  ;;  %p519_p4 = scmp.lt.u32.totalorder %s515_s14, %s740_s8 }
 0x141   :  { %p521_p5 = pnand %p519_p4, %p516_p3 }
 0x143   :  { %524 = shalt.err (!%p521_p5)
}
 0x144   :  { %306 = dma.vmem_to_hbm [thread:$0]  %s684_s21, 64, %s740_s8, [#allocation12]   ;;  %v279_v24 = vadd.f32 %v339_v22, %v278_v23  ;;  %v374_v25 = vpop.f32.mrb[5].mxu0  ;;  %vm285_vm3 = vcmask 273408  }
 0x145   :  { %v281_v26 = vpop.f32.mrb[6].mxu0  ;;  %s525_s15 = scalar_lea.vmem %s314_s12, 64  ;;  %p530_p7 = scmp.lt.s32.totalorder %s314_s12, %s314_s12 }
 0x146   :  { %v284_v27 = vpack.c.bf16 %v279_v24, %v279_v24  ;;  %v375_v28 = vpop.f32.mrb[7].mxu0  ;;  %p526_p6 = scmp.ne.s32.totalorder %s314_s12, %s525_s15  ;;  %p531_p8 = scmp.lt.s32.totalorder %s525_s15, %s525_s15 }
 0x148   :  { %286 = vst.msk [vmem:[#allocation13] sm:$0xf] %vm285_vm3, %v284_v27  ;;  %p532_p9 = por %p531_p8, %p530_p7 }
 0x14a   :  { %p533_p10 = pnand %p532_p9, %p526_p6 }
 0x14c   :  { %536 = shalt.err (!%p533_p10)
}
 0x14d   :  { %s537_s18 = scalar_lea.hbm %s741_s9, 64 }
 0x14e   :  { %p538_p11 = scmp.ne.s32.totalorder %s741_s9, %s537_s18  ;;  %p541_p12 = scmp.lt.u32.totalorder %s537_s18, %s741_s9 }
 0x150   :  { %p543_p13 = pnand %p541_p12, %p538_p11 }
 0x152   :  { %546 = shalt.err (!%p543_p13)
}
 0x153   :  { %316 = dma.vmem_to_hbm [thread:$0]  %s314_s12, 64, %s741_s9, [#allocation12]  }
 0x154   :  { %553 = dma.done.wait [#allocation4], 64  }
 0x155   :  { %554 = vsyncadd [#allocation4], 4294967232 }
 0x156   :  { %555 = dma.done.wait [#allocation12], 128  }
 0x157   :  { %556 = vsyncadd [#allocation12], 4294967168 }
 0x158   :  { %326 = vsyncpa [#allocation3], 1 }
 0x159   :  { %327 = vsyncpa [#allocation6], 1 }
 0x15a   :  { %328 = vsyncpa [#allocation9], 1 }
 0x15b   :  { %329 = vsyncpa [#allocation4], 1 }
 0x15c   :  { %330 = vsyncpa [#allocation12], 1 }

</bundles_post_ra>
